<compile_context>
chip_gen: v5e
topology: v5e:2x2
jax: 0.10.0
libtpu: 0.0.40
codegen_flags: <defaults>
</compile_context>

<pallas_src>
import math

import jax
import jax.numpy as jnp
from jax import lax
from jax.experimental import pallas as pl
from jax.experimental.pallas import tpu as pltpu

# ---------------- model hyper-params (small, consistent with the module) ----------------
B = 2           # batch
T = 8           # sequence length (tokens / patches)
D = 32          # num_hiddens
H = 4           # num_heads
DH = D // H     # per-head dim
M = 64          # mlp_hiddens
BT = B * T      # flattened token count
HBT = H * BT    # head-stacked row count
LN_EPS = 1e-5   # PyTorch LayerNorm default eps

assert (T & (T - 1)) == 0 and (BT & (BT - 1)) == 0 and (DH & (DH - 1)) == 0
T_LOG2 = T.bit_length() - 1
BT_LOG2 = BT.bit_length() - 1
DH_LOG2 = DH.bit_length() - 1

# TODO(synk): dropout layers are treated as identity (inference/eval semantics);
# PyTorch's nn.Dropout only changes behavior in training mode.


def _layernorm(x, gamma, beta):
    mu = jnp.mean(x, axis=-1, keepdims=True)
    var = jnp.mean((x - mu) * (x - mu), axis=-1, keepdims=True)
    return (x - mu) * lax.rsqrt(var + LN_EPS) * gamma + beta


_SQRT1_2 = 0.7071067811865476


def _erf(x):
    # Abramowitz & Stegun 7.1.26 rational approximation, |abs err| <= 1.5e-7 (f32-exact
    # for this use).  Built only from exp / divide / VPU ops so it lowers on Mosaic
    # without relying on a lax.erf rule; the exp lands on the otherwise-idle EUP slot.
    p_ = 0.3275911
    a1, a2, a3, a4, a5 = 0.254829592, -0.284496736, 1.421413741, -1.453152027, 1.061405429
    ax = jnp.abs(x)
    t = 1.0 / (1.0 + p_ * ax)
    poly = ((((a5 * t + a4) * t + a3) * t + a2) * t + a1) * t
    y = 1.0 - poly * jnp.exp(-ax * ax)
    return jnp.where(x >= 0, y, -y)


def _gelu_exact(x):
    # PyTorch nn.GELU() default (erf form).
    return 0.5 * x * (1.0 + _erf(x * _SQRT1_2))


def transformer_block_kernel(
    x_ref,       # (BT, D)   flattened (batch*seq, hidden)
    vec_ref,     # (8, M)    packed small vectors: rows 0..6 = g1,b1,bh,g2,b2,c1,c2
    wqkv_ref,    # (D, 3D)   fused Q|K|V, Q part pre-scaled by 1/sqrt(DH)
    wh_ref,      # (D, D)
    w1_ref,      # (D, M)
    w2_ref,      # (M, D)
    o_ref,       # (BT, D)
):
    f32 = jnp.float32
    x = x_ref[...]                                        # (BT, D)
    vec = vec_ref[...]                                    # (8, M) -- single small load
    g1 = vec[0:1, :D]
    b1 = vec[1:2, :D]
    bh = vec[2:3, :D]
    g2 = vec[3:4, :D]
    b2 = vec[4:5, :D]
    c1 = vec[5:6, :M]
    c2 = vec[6:7, :D]

    # ---- LayerNorm 1 + fused QKV projection (one MXU matmul instead of three) ----
    xn = _layernorm(x, g1, b1)
    qkv = jnp.dot(xn, wqkv_ref[...], preferred_element_type=f32)        # (BT, 3D)
    q = qkv[:, 0 * D:1 * D]   # already scaled by 1/sqrt(DH) (folded into wqkv)
    k = qkv[:, 1 * D:2 * D]
    v = qkv[:, 2 * D:3 * D]

    # ---- multi-head self-attention with heads stacked along the sublane axis ----
    # Rows [h*BT:(h+1)*BT] of q_st hold q masked to head h's feature lanes, so a single
    # NT matmul against (unmasked) K yields every (head, query, key) score, one row-wise
    # softmax covers all heads/batches, and a single PV matmul produces all head outputs.
    # Masking the result and summing the H sublane blocks reproduces concat_heads with no
    # per-head loop, lane transposes, or loop-carried accumulation.
    row = lax.broadcasted_iota(jnp.int32, (HBT, D), 0)
    lane = lax.broadcasted_iota(jnp.int32, (HBT, D), 1)
    head_mask = ((row >> BT_LOG2) == (lane >> DH_LOG2)).astype(f32)     # (HBT, D)

    q_st = jnp.concatenate([q] * H, axis=0) * head_mask                 # (HBT, D)

    # Batch block-diagonal additive bias (tokens never attend across batches), built
    # in-kernel from iotas + shifts -> removes a (BT,BT) operand DMA and a wrapper fusion.
    r = lax.broadcasted_iota(jnp.int32, (HBT, BT), 0)
    c = lax.broadcasted_iota(jnp.int32, (HBT, BT), 1)
    same_batch = ((r & (BT - 1)) >> T_LOG2) == (c >> T_LOG2)
    bias = jnp.where(same_batch, 0.0, -1e30).astype(f32)                # (HBT, BT)

    s = lax.dot_general(q_st, k, (((1,), (1,)), ((), ())),
                        preferred_element_type=f32) + bias              # (HBT, BT)
    s = s - jnp.max(s, axis=-1, keepdims=True)
    p = jnp.exp(s)
    p = p / jnp.sum(p, axis=-1, keepdims=True)   # exact divide (keeps the 1e-4 check)

    o_st = jnp.dot(p, v, preferred_element_type=f32) * head_mask        # (HBT, D)
    attn = o_st[0:BT]
    for h in range(1, H):                        # static, sublane-aligned slices + adds
        attn = attn + o_st[h * BT:(h + 1) * BT]                         # (BT, D)

    attn = jnp.dot(attn, wh_ref[...], preferred_element_type=f32) + bh
    x1 = x + attn                                # residual 1

    # ---- LayerNorm 2 + MLP ----
    xn2 = _layernorm(x1, g2, b2)
    y = jnp.dot(xn2, w1_ref[...], preferred_element_type=f32) + c1
    y = _gelu_exact(y)                           # PyTorch nn.GELU default = exact erf
    y = jnp.dot(y, w2_ref[...], preferred_element_type=f32) + c2

    o_ref[...] = (x1 + y).astype(o_ref.dtype)    # residual 2


def transformer_block(x, kernel_params):
    """x: (B, T, D). Single no-grid Pallas program; all operands VMEM-resident."""
    vec, wqkv, wh, w1, w2 = kernel_params
    b, t, d = x.shape
    x2 = x.reshape(b * t, d)                     # free row-major wrapper reshape

    vmem = lambda: pl.BlockSpec(memory_space=pltpu.MemorySpace.VMEM)
    out2 = pl.pallas_call(
        transformer_block_kernel,
        out_shape=jax.ShapeDtypeStruct((b * t, d), x.dtype),
        in_specs=[vmem() for _ in range(6)],
        out_specs=vmem(),
        # No grid: one program, latency-bound at BT=16.  Padded operand footprint is
        # ~100 KiB -- trivial vs the scoped VMEM limit on v5e/v6e (128 MiB) and v7x (64 MiB).
        # NOTE(v7x): do NOT shard across the two TensorCores at this size; per-core work is
        #   sub-microsecond, so a ("parallel",) batch axis would be pure grid/sync overhead.
        #   Reintroduce a grid only once per-core MXU work reaches several microseconds.
        # NOTE(v7x): if B*T grows, the (H*BT, BT) score tile is quadratic in tokens -- switch
        #   to a KV-tiled flash-style grid (reduction axis last, "arbitrary") well before the
        #   padded footprint approaches v7x's smaller 64 MiB VMEM.
        # NOTE(v6e/v7x): at larger D/M/T, cast matmul operands to bf16 (keep f32 accumulate
        #   and f32 softmax/LN/bias math) for ~3x fewer MXU passes.  Not done here: it buys
        #   nothing at these tiny overhead-bound shapes and would loosen the 1e-4 check.
    )(x2, vec, wqkv, wh, w1, w2)
    return out2.reshape(b, t, d)


def init_params(key):
    """Raw parameters matching the PyTorch layers (linear weights stored as (in, out))."""
    ks = jax.random.split(key, 9)
    scale = 0.05
    g1 = jnp.ones((1, D), jnp.float32)
    b1 = jnp.zeros((1, D), jnp.float32)
    g2 = jnp.ones((1, D), jnp.float32)
    b2 = jnp.zeros((1, D), jnp.float32)
    wq = scale * jax.random.normal(ks[0], (D, D), jnp.float32)
    wk = scale * jax.random.normal(ks[1], (D, D), jnp.float32)
    wv = scale * jax.random.normal(ks[2], (D, D), jnp.float32)
    wh = scale * jax.random.normal(ks[3], (D, D), jnp.float32)
    bh = scale * jax.random.normal(ks[4], (1, D), jnp.float32)
    w1 = scale * jax.random.normal(ks[5], (D, M), jnp.float32)
    c1 = scale * jax.random.normal(ks[6], (1, M), jnp.float32)
    w2 = scale * jax.random.normal(ks[7], (M, D), jnp.float32)
    c2 = scale * jax.random.normal(ks[8], (1, D), jnp.float32)
    return (g1, b1, wq, wk, wv, wh, bh, g2, b2, w1, c1, w2, c2)


def fuse_params(raw):
    """One-time transform: fuse Q|K|V (softmax scale folded into Q) and pack the seven
    small bias/affine vectors into one (8, M) slab -> kernel sees 6 operands, not 13."""
    (g1, b1, wq, wk, wv, wh, bh, g2, b2, w1, c1, w2, c2) = raw
    wqkv = jnp.concatenate([wq * (1.0 / math.sqrt(DH)), wk, wv], axis=1)   # (D, 3D)
    vec = jnp.zeros((8, M), jnp.float32)
    for i, vrow in enumerate((g1, b1, bh, g2, b2, c1, c2)):
        vec = vec.at[i, :vrow.shape[-1]].set(vrow.reshape(-1))
    return (vec, wqkv, wh, w1, w2)


def reference(x, raw):
    """Pure-JAX mirror of the PyTorch forward pass (eval mode) for sanity checking."""
    (g1, b1, wq, wk, wv, wh, bh, g2, b2, w1, c1, w2, c2) = raw
    xn = _layernorm(x, g1, b1)
    q, k, v = xn @ wq, xn @ wk, xn @ wv
    split = lambda a: a.reshape(B, T, H, DH).transpose(0, 2, 1, 3)
    qh, kh, vh = split(q), split(k), split(v)
    s = jnp.einsum("bhqd,bhkd->bhqk", qh, kh) / math.sqrt(DH)
    p = jax.nn.softmax(s, axis=-1)
    o = jnp.einsum("bhqk,bhkd->bhqd", p, vh)
    o = o.transpose(0, 2, 1, 3).reshape(B, T, D)
    x1 = x + (o @ wh + bh)
    xn2 = _layernorm(x1, g2, b2)
    y = jax.nn.gelu(xn2 @ w1 + c1, approximate=False) @ w2 + c2
    return x1 + y


if __name__ == "__main__":
    key = jax.random.PRNGKey(0)
    kx, kp = jax.random.split(key)
    x = jax.random.normal(kx, (B, T, D), jnp.float32)
    raw = init_params(kp)
    kparams = fuse_params(raw)

    out = transformer_block(x, kparams)
    out = jax.block_until_ready(out)

    ref = reference(x, raw)
    assert out.shape == (B, T, D)
    err = float(jnp.max(jnp.abs(out - ref)))
    # All math is f32 with exact softmax division and erf-exact GELU -> tight tolerance.
    assert jnp.allclose(out, ref, atol=1e-4, rtol=1e-4), f"max abs err = {err}"
    print("KERNEL_OK")
</pallas_src>

<mosaic_0001>
module attributes {stable_mosaic.version = 11 : i64} {
  func.func @transformer_block_kernel(%arg0: memref<16x32xf32, #tpu.memory_space<vmem>>, %arg1: memref<8x64xf32, #tpu.memory_space<vmem>>, %arg2: memref<32x96xf32, #tpu.memory_space<vmem>>, %arg3: memref<32x32xf32, #tpu.memory_space<vmem>>, %arg4: memref<32x64xf32, #tpu.memory_space<vmem>>, %arg5: memref<64x32xf32, #tpu.memory_space<vmem>>, %arg6: memref<16x32xf32, #tpu.memory_space<vmem>>) attributes {dimension_semantics = [], scalar_prefetch = 0 : i64, scratch_operands = 0 : i64, tpu.core_type = #tpu.core_type<tc>} {
    %c0 = arith.constant 0 : index
    %c0_0 = arith.constant 0 : index
    %0 = vector.load %arg0[%c0, %c0_0] : memref<16x32xf32, #tpu.memory_space<vmem>>, vector<16x32xf32>
    %c0_1 = arith.constant 0 : index
    %c0_2 = arith.constant 0 : index
    %1 = vector.load %arg1[%c0_1, %c0_2] : memref<8x64xf32, #tpu.memory_space<vmem>>, vector<8x64xf32>
    %2 = vector.extract_strided_slice %1 {offsets = [0, 0], sizes = [1, 32], strides = [1, 1]} : vector<8x64xf32> to vector<1x32xf32>
    %3 = vector.extract_strided_slice %1 {offsets = [1, 0], sizes = [1, 32], strides = [1, 1]} : vector<8x64xf32> to vector<1x32xf32>
    %4 = vector.extract_strided_slice %1 {offsets = [2, 0], sizes = [1, 32], strides = [1, 1]} : vector<8x64xf32> to vector<1x32xf32>
    %5 = vector.extract_strided_slice %1 {offsets = [3, 0], sizes = [1, 32], strides = [1, 1]} : vector<8x64xf32> to vector<1x32xf32>
    %6 = vector.extract_strided_slice %1 {offsets = [4, 0], sizes = [1, 32], strides = [1, 1]} : vector<8x64xf32> to vector<1x32xf32>
    %7 = vector.extract_strided_slice %1 {offsets = [5, 0], sizes = [1, 64], strides = [1, 1]} : vector<8x64xf32> to vector<1x64xf32>
    %8 = vector.extract_strided_slice %1 {offsets = [6, 0], sizes = [1, 32], strides = [1, 1]} : vector<8x64xf32> to vector<1x32xf32>
    %cst = arith.constant dense<0.000000e+00> : vector<16xf32>
    %9 = vector.multi_reduction <add>, %0, %cst [1] : vector<16x32xf32> to vector<16xf32>
    %10 = vector.shape_cast %9 : vector<16xf32> to vector<16x1xf32>
    %cst_3 = arith.constant 3.200000e+01 : f32
    %11 = vector.broadcast %cst_3 : f32 to vector<16x1xf32>
    %12 = arith.divf %10, %11 : vector<16x1xf32>
    %13 = vector.broadcast %12 : vector<16x1xf32> to vector<16x32xf32>
    %14 = arith.subf %0, %13 : vector<16x32xf32>
    %15 = vector.broadcast %12 : vector<16x1xf32> to vector<16x32xf32>
    %16 = arith.subf %0, %15 : vector<16x32xf32>
    %17 = arith.mulf %14, %16 : vector<16x32xf32>
    %cst_4 = arith.constant dense<0.000000e+00> : vector<16xf32>
    %18 = vector.multi_reduction <add>, %17, %cst_4 [1] : vector<16x32xf32> to vector<16xf32>
    %19 = vector.shape_cast %18 : vector<16xf32> to vector<16x1xf32>
    %cst_5 = arith.constant 3.200000e+01 : f32
    %20 = vector.broadcast %cst_5 : f32 to vector<16x1xf32>
    %21 = arith.divf %19, %20 : vector<16x1xf32>
    %22 = vector.broadcast %12 : vector<16x1xf32> to vector<16x32xf32>
    %23 = arith.subf %0, %22 : vector<16x32xf32>
    %cst_6 = arith.constant 9.99999974E-6 : f32
    %24 = vector.broadcast %cst_6 : f32 to vector<16x1xf32>
    %25 = arith.addf %21, %24 : vector<16x1xf32>
    %26 = math.rsqrt %25 : vector<16x1xf32>
    %27 = vector.broadcast %26 : vector<16x1xf32> to vector<16x32xf32>
    %28 = arith.mulf %23, %27 : vector<16x32xf32>
    %29 = vector.broadcast %2 : vector<1x32xf32> to vector<16x32xf32>
    %30 = arith.mulf %28, %29 : vector<16x32xf32>
    %31 = vector.broadcast %3 : vector<1x32xf32> to vector<16x32xf32>
    %32 = arith.addf %30, %31 : vector<16x32xf32>
    %c0_7 = arith.constant 0 : index
    %c0_8 = arith.constant 0 : index
    %33 = vector.load %arg2[%c0_7, %c0_8] : memref<32x96xf32, #tpu.memory_space<vmem>>, vector<32x96xf32>
    %cst_9 = arith.constant dense<0.000000e+00> : vector<16x96xf32>
    %34 = tpu.matmul %32, %33, %cst_9 {dimension_numbers = #tpu.dot_dimension_numbers<[1], [0], [0], [1], [0, 0, 1, 1], [], []>} : vector<16x32xf32>, vector<32x96xf32>, vector<16x96xf32> -> vector<16x96xf32>
    %35 = vector.extract_strided_slice %34 {offsets = [0, 0], sizes = [16, 32], strides = [1, 1]} : vector<16x96xf32> to vector<16x32xf32>
    %36 = vector.extract_strided_slice %34 {offsets = [0, 32], sizes = [16, 32], strides = [1, 1]} : vector<16x96xf32> to vector<16x32xf32>
    %37 = vector.extract_strided_slice %34 {offsets = [0, 64], sizes = [16, 32], strides = [1, 1]} : vector<16x96xf32> to vector<16x32xf32>
    %38 = tpu.iota {dimensions = array<i32: 0>} : vector<64x32xi32>
    %39 = tpu.iota {dimensions = array<i32: 1>} : vector<64x32xi32>
    %c4_i32 = arith.constant 4 : i32
    %40 = vector.broadcast %c4_i32 : i32 to vector<64x32xi32>
    %41 = arith.shrsi %38, %40 : vector<64x32xi32>
    %c3_i32 = arith.constant 3 : i32
    %42 = vector.broadcast %c3_i32 : i32 to vector<64x32xi32>
    %43 = arith.shrsi %39, %42 : vector<64x32xi32>
    %44 = arith.cmpi eq, %41, %43 : vector<64x32xi32>
    %45 = arith.extui %44 : vector<64x32xi1> to vector<64x32xi32>
    %46 = arith.sitofp %45 : vector<64x32xi32> to vector<64x32xf32>
    %47 = tpu.concatenate %35, %35, %35, %35 in 0 : vector<16x32xf32>, vector<16x32xf32>, vector<16x32xf32>, vector<16x32xf32> -> vector<64x32xf32>
    %48 = arith.mulf %47, %46 : vector<64x32xf32>
    %49 = tpu.iota {dimensions = array<i32: 0>} : vector<64x16xi32>
    %50 = tpu.iota {dimensions = array<i32: 1>} : vector<64x16xi32>
    %c15_i32 = arith.constant 15 : i32
    %51 = vector.broadcast %c15_i32 : i32 to vector<64x16xi32>
    %52 = arith.andi %49, %51 : vector<64x16xi32>
    %c3_i32_10 = arith.constant 3 : i32
    %53 = vector.broadcast %c3_i32_10 : i32 to vector<64x16xi32>
    %54 = arith.shrsi %52, %53 : vector<64x16xi32>
    %c3_i32_11 = arith.constant 3 : i32
    %55 = vector.broadcast %c3_i32_11 : i32 to vector<64x16xi32>
    %56 = arith.shrsi %50, %55 : vector<64x16xi32>
    %57 = arith.cmpi eq, %54, %56 : vector<64x16xi32>
    %cst_12 = arith.constant 0.000000e+00 : f32
    %cst_13 = arith.constant -1.000000e+30 : f32
    %58 = vector.broadcast %cst_12 : f32 to vector<64x16xf32>
    %59 = vector.broadcast %cst_13 : f32 to vector<64x16xf32>
    %60 = arith.select %57, %58, %59 : vector<64x16xi1>, vector<64x16xf32>
    %cst_14 = arith.constant dense<0.000000e+00> : vector<64x16xf32>
    %61 = tpu.matmul %48, %36, %cst_14 {dimension_numbers = #tpu.dot_dimension_numbers<[1], [1], [0], [0], [0, 0, 1, 0], [], []>} : vector<64x32xf32>, vector<16x32xf32>, vector<64x16xf32> -> vector<64x16xf32>
    %62 = arith.addf %61, %60 : vector<64x16xf32>
    %cst_15 = arith.constant dense<0xFF800000> : vector<64xf32>
    %63 = vector.multi_reduction <maximumf>, %62, %cst_15 [1] : vector<64x16xf32> to vector<64xf32>
    %64 = vector.shape_cast %63 : vector<64xf32> to vector<64x1xf32>
    %65 = vector.broadcast %64 : vector<64x1xf32> to vector<64x16xf32>
    %66 = arith.subf %62, %65 : vector<64x16xf32>
    %67 = math.exp %66 : vector<64x16xf32>
    %cst_16 = arith.constant dense<0.000000e+00> : vector<64xf32>
    %68 = vector.multi_reduction <add>, %67, %cst_16 [1] : vector<64x16xf32> to vector<64xf32>
    %69 = vector.shape_cast %68 : vector<64xf32> to vector<64x1xf32>
    %70 = vector.broadcast %69 : vector<64x1xf32> to vector<64x16xf32>
    %71 = arith.divf %67, %70 : vector<64x16xf32>
    %cst_17 = arith.constant dense<0.000000e+00> : vector<64x32xf32>
    %72 = tpu.matmul %71, %37, %cst_17 {dimension_numbers = #tpu.dot_dimension_numbers<[1], [0], [0], [1], [0, 0, 1, 1], [], []>} : vector<64x16xf32>, vector<16x32xf32>, vector<64x32xf32> -> vector<64x32xf32>
    %73 = arith.mulf %72, %46 : vector<64x32xf32>
    %74 = vector.extract_strided_slice %73 {offsets = [0, 0], sizes = [16, 32], strides = [1, 1]} : vector<64x32xf32> to vector<16x32xf32>
    %75 = vector.extract_strided_slice %73 {offsets = [16, 0], sizes = [16, 32], strides = [1, 1]} : vector<64x32xf32> to vector<16x32xf32>
    %76 = arith.addf %74, %75 : vector<16x32xf32>
    %77 = vector.extract_strided_slice %73 {offsets = [32, 0], sizes = [16, 32], strides = [1, 1]} : vector<64x32xf32> to vector<16x32xf32>
    %78 = arith.addf %76, %77 : vector<16x32xf32>
    %79 = vector.extract_strided_slice %73 {offsets = [48, 0], sizes = [16, 32], strides = [1, 1]} : vector<64x32xf32> to vector<16x32xf32>
    %80 = arith.addf %78, %79 : vector<16x32xf32>
    %c0_18 = arith.constant 0 : index
    %c0_19 = arith.constant 0 : index
    %81 = vector.load %arg3[%c0_18, %c0_19] : memref<32x32xf32, #tpu.memory_space<vmem>>, vector<32x32xf32>
    %cst_20 = arith.constant dense<0.000000e+00> : vector<16x32xf32>
    %82 = tpu.matmul %80, %81, %cst_20 {dimension_numbers = #tpu.dot_dimension_numbers<[1], [0], [0], [1], [0, 0, 1, 1], [], []>} : vector<16x32xf32>, vector<32x32xf32>, vector<16x32xf32> -> vector<16x32xf32>
    %83 = vector.broadcast %4 : vector<1x32xf32> to vector<16x32xf32>
    %84 = arith.addf %82, %83 : vector<16x32xf32>
    %85 = arith.addf %0, %84 : vector<16x32xf32>
    %cst_21 = arith.constant dense<0.000000e+00> : vector<16xf32>
    %86 = vector.multi_reduction <add>, %85, %cst_21 [1] : vector<16x32xf32> to vector<16xf32>
    %87 = vector.shape_cast %86 : vector<16xf32> to vector<16x1xf32>
    %cst_22 = arith.constant 3.200000e+01 : f32
    %88 = vector.broadcast %cst_22 : f32 to vector<16x1xf32>
    %89 = arith.divf %87, %88 : vector<16x1xf32>
    %90 = vector.broadcast %89 : vector<16x1xf32> to vector<16x32xf32>
    %91 = arith.subf %85, %90 : vector<16x32xf32>
    %92 = vector.broadcast %89 : vector<16x1xf32> to vector<16x32xf32>
    %93 = arith.subf %85, %92 : vector<16x32xf32>
    %94 = arith.mulf %91, %93 : vector<16x32xf32>
    %cst_23 = arith.constant dense<0.000000e+00> : vector<16xf32>
    %95 = vector.multi_reduction <add>, %94, %cst_23 [1] : vector<16x32xf32> to vector<16xf32>
    %96 = vector.shape_cast %95 : vector<16xf32> to vector<16x1xf32>
    %cst_24 = arith.constant 3.200000e+01 : f32
    %97 = vector.broadcast %cst_24 : f32 to vector<16x1xf32>
    %98 = arith.divf %96, %97 : vector<16x1xf32>
    %99 = vector.broadcast %89 : vector<16x1xf32> to vector<16x32xf32>
    %100 = arith.subf %85, %99 : vector<16x32xf32>
    %cst_25 = arith.constant 9.99999974E-6 : f32
    %101 = vector.broadcast %cst_25 : f32 to vector<16x1xf32>
    %102 = arith.addf %98, %101 : vector<16x1xf32>
    %103 = math.rsqrt %102 : vector<16x1xf32>
    %104 = vector.broadcast %103 : vector<16x1xf32> to vector<16x32xf32>
    %105 = arith.mulf %100, %104 : vector<16x32xf32>
    %106 = vector.broadcast %5 : vector<1x32xf32> to vector<16x32xf32>
    %107 = arith.mulf %105, %106 : vector<16x32xf32>
    %108 = vector.broadcast %6 : vector<1x32xf32> to vector<16x32xf32>
    %109 = arith.addf %107, %108 : vector<16x32xf32>
    %c0_26 = arith.constant 0 : index
    %c0_27 = arith.constant 0 : index
    %110 = vector.load %arg4[%c0_26, %c0_27] : memref<32x64xf32, #tpu.memory_space<vmem>>, vector<32x64xf32>
    %cst_28 = arith.constant dense<0.000000e+00> : vector<16x64xf32>
    %111 = tpu.matmul %109, %110, %cst_28 {dimension_numbers = #tpu.dot_dimension_numbers<[1], [0], [0], [1], [0, 0, 1, 1], [], []>} : vector<16x32xf32>, vector<32x64xf32>, vector<16x64xf32> -> vector<16x64xf32>
    %112 = vector.broadcast %7 : vector<1x64xf32> to vector<16x64xf32>
    %113 = arith.addf %111, %112 : vector<16x64xf32>
    %cst_29 = arith.constant 5.000000e-01 : f32
    %114 = vector.broadcast %cst_29 : f32 to vector<16x64xf32>
    %115 = arith.mulf %114, %113 : vector<16x64xf32>
    %cst_30 = arith.constant 0.707106769 : f32
    %116 = vector.broadcast %cst_30 : f32 to vector<16x64xf32>
    %117 = arith.mulf %113, %116 : vector<16x64xf32>
    %118 = math.absf %117 : vector<16x64xf32>
    %cst_31 = arith.constant 0.327591091 : f32
    %119 = vector.broadcast %cst_31 : f32 to vector<16x64xf32>
    %120 = arith.mulf %119, %118 : vector<16x64xf32>
    %cst_32 = arith.constant 1.000000e+00 : f32
    %121 = vector.broadcast %cst_32 : f32 to vector<16x64xf32>
    %122 = arith.addf %121, %120 : vector<16x64xf32>
    %cst_33 = arith.constant 1.000000e+00 : f32
    %123 = vector.broadcast %cst_33 : f32 to vector<16x64xf32>
    %124 = arith.divf %123, %122 : vector<16x64xf32>
    %cst_34 = arith.constant 1.06140542 : f32
    %125 = vector.broadcast %cst_34 : f32 to vector<16x64xf32>
    %126 = arith.mulf %125, %124 : vector<16x64xf32>
    %cst_35 = arith.constant -1.45315206 : f32
    %127 = vector.broadcast %cst_35 : f32 to vector<16x64xf32>
    %128 = arith.addf %126, %127 : vector<16x64xf32>
    %129 = arith.mulf %128, %124 : vector<16x64xf32>
    %cst_36 = arith.constant 1.42141378 : f32
    %130 = vector.broadcast %cst_36 : f32 to vector<16x64xf32>
    %131 = arith.addf %129, %130 : vector<16x64xf32>
    %132 = arith.mulf %131, %124 : vector<16x64xf32>
    %cst_37 = arith.constant -0.284496725 : f32
    %133 = vector.broadcast %cst_37 : f32 to vector<16x64xf32>
    %134 = arith.addf %132, %133 : vector<16x64xf32>
    %135 = arith.mulf %134, %124 : vector<16x64xf32>
    %cst_38 = arith.constant 0.254829586 : f32
    %136 = vector.broadcast %cst_38 : f32 to vector<16x64xf32>
    %137 = arith.addf %135, %136 : vector<16x64xf32>
    %138 = arith.mulf %137, %124 : vector<16x64xf32>
    %cst_39 = arith.constant 0.000000e+00 : f32
    %139 = vector.broadcast %cst_39 : f32 to vector<16x64xf32>
    %140 = arith.subf %139, %118 : vector<16x64xf32>
    %141 = arith.mulf %140, %118 : vector<16x64xf32>
    %142 = math.exp %141 : vector<16x64xf32>
    %143 = arith.mulf %138, %142 : vector<16x64xf32>
    %cst_40 = arith.constant 1.000000e+00 : f32
    %144 = vector.broadcast %cst_40 : f32 to vector<16x64xf32>
    %145 = arith.subf %144, %143 : vector<16x64xf32>
    %cst_41 = arith.constant 0.000000e+00 : f32
    %146 = vector.broadcast %cst_41 : f32 to vector<16x64xf32>
    %147 = arith.cmpf oge, %117, %146 : vector<16x64xf32>
    %cst_42 = arith.constant 0.000000e+00 : f32
    %148 = vector.broadcast %cst_42 : f32 to vector<16x64xf32>
    %149 = arith.subf %148, %145 : vector<16x64xf32>
    %150 = arith.select %147, %145, %149 : vector<16x64xi1>, vector<16x64xf32>
    %cst_43 = arith.constant 1.000000e+00 : f32
    %151 = vector.broadcast %cst_43 : f32 to vector<16x64xf32>
    %152 = arith.addf %151, %150 : vector<16x64xf32>
    %153 = arith.mulf %115, %152 : vector<16x64xf32>
    %c0_44 = arith.constant 0 : index
    %c0_45 = arith.constant 0 : index
    %154 = vector.load %arg5[%c0_44, %c0_45] : memref<64x32xf32, #tpu.memory_space<vmem>>, vector<64x32xf32>
    %cst_46 = arith.constant dense<0.000000e+00> : vector<16x32xf32>
    %155 = tpu.matmul %153, %154, %cst_46 {dimension_numbers = #tpu.dot_dimension_numbers<[1], [0], [0], [1], [0, 0, 1, 1], [], []>} : vector<16x64xf32>, vector<64x32xf32>, vector<16x32xf32> -> vector<16x32xf32>
    %156 = vector.broadcast %8 : vector<1x32xf32> to vector<16x32xf32>
    %157 = arith.addf %155, %156 : vector<16x32xf32>
    %158 = arith.addf %85, %157 : vector<16x32xf32>
    %c0_47 = arith.constant 0 : index
    %c0_48 = arith.constant 0 : index
    %159 = vector.load %arg6[%c0_47, %c0_48] : memref<16x32xf32, #tpu.memory_space<vmem>>, vector<16x32xf32>
    tpu.vector_store %arg6[%c0_47, %c0_48], %158 {strides = array<i32>} : memref<16x32xf32, #tpu.memory_space<vmem>>, vector<16x32xf32>,
    return
  }
}

</mosaic_0001>

<bundles_post_ra>
// kernel: tpu_custom_call.1
= control target key start
LH: loop header
LB: loop body
LE: loop exit
PB: predicated region body
PF: predicated region fallthrough
CT: control target
= control target key end

     0   :  { %11 = vsyncpa [#allocation3], 0  ;;  %s1416_s0 = inlined_call_operand.hbm [shape: f32[16,32], index: 0, kind: input, shape index: {}]   ;;  %s1417_s1 = inlined_call_operand.hbm [shape: f32[8,64], index: 1, kind: input, shape index: {}]   ;;  %s1418_s2 = inlined_call_operand.vmem [shape: f32[32,96], index: 2, kind: input, shape index: {}]   ;;  %s1419_s3 = inlined_call_operand.vmem [shape: f32[32,32], index: 3, kind: input, shape index: {}]   ;;  %s1420_s4 = inlined_call_operand.vmem [shape: f32[32,64], index: 4, kind: input, shape index: {}]   ;;  %s1421_s5 = inlined_call_operand.vmem [shape: f32[64,32], index: 5, kind: input, shape index: {}]   ;;  %s1422_s6 = inlined_call_operand.hbm [shape: f32[16,32], index: 6, kind: output, shape index: {}]  }
   0x1   :  { %12 = vsyncpa [#allocation6], 0 }
   0x2   :  { %13 = vsyncpa [#allocation4], 0  ;;  %s18_s23 = sshll.u32 %s1416_s0, 4  ;;  %s1030_s24 = smov [#allocation2]   ;;  %s19_s23 = int_to_ptr.hbm [resolvable:$true] %s18_s23 }
   0x3   :  { %s20_s25 = sshll.u32 %s1030_s24, 4  ;;  %s32_s28 = sshll.u32 %s1417_s1, 4  ;;  %s21_s25 = int_to_ptr.vmem [resolvable:$true] %s20_s25  ;;  %s33_s28 = int_to_ptr.hbm [resolvable:$true] %s32_s28 }
   0x4   :  { %s1031_s29 = smov 128   ;;  %s1032_s30 = smov 8  }
   0x5   :  { %26 = dma.hbm_to_vmem [thread:$0]  %s19_s23, 256, %s21_s25, [#allocation3], %s1031_s29, %s1031_s29, %s1032_s30  }
   0x6   :  { %s1033_s7 = smov [#allocation5]  }
   0x7   :  { %s34_s8 = sshll.u32 %s1033_s7, 4  ;;  %s35_s8 = int_to_ptr.vmem [resolvable:$true] %s34_s8 }
   0x8   :  { %37 = dma.hbm_to_vmem [thread:$0]  %s33_s28, 128, %s35_s8, [#allocation6]  }
   0x9   :  { %1024 = dma.done.wait [#allocation3], 256  }
   0xa   :  { %1025 = vsyncadd [#allocation3], 4294967040 }
   0xb   :  { %1026 = dma.done.wait [#allocation6], 128  }
   0xc   :  { %1027 = vsyncadd [#allocation6], 4294967168  ;;  %vm57_vm0 = vcmask 261120   ;;  %v1084_v0 = vld [vmem:[#allocation2] sm:$0xff]  ;;  %v1088_v2 = vld [vmem:[#allocation2 + $0x8] sm:$0xff]  ;;  %v1034_v4 = vmov 32.0   ;;  %v148_v56 = vlaneseq }
   0xd   :  { %v58_v1 = vsel %vm57_vm0, %v1084_v0, 0.0  ;;  %v61_v3 = vsel %vm57_vm0, %v1088_v2, 0.0  ;;  %901 = vrcp.f32 %v1034_v4  ;;  %v118_v21 = vld [vmem:[%s1418_s2 + $0x18] sm:$0xff]  ;;  %v117_v22 = vld [vmem:[%s1418_s2 + $0x10] sm:$0xff]  ;;  %v116_v23 = vld [vmem:[%s1418_s2 + $0x8] sm:$0xff]  ;;  %v1036_v4 = vmov 0.0  }
   0xe   :  { %59 = vadd.xlane.f32.xlu0 %v58_v1  ;;  %137 = vmatpush.msra.mxu0 %v118_v21  ;;  %v115_v24 = vld [vmem:[%s1418_s2] sm:$0xff]  ;;  %v1114_v36 = vld [vmem:[#allocation5] sm:$0xff]  ;;  %s1035_s2 = smov 96   ;;  %v149_v57 = vshrl.u32 %v148_v56, 7  ;;  %v158_v58 = vand.u32 127, %v148_v56  ;;  %s1038_s15 = smov 64  }
   0xf   :  { %v109_v40 = vperm.slane %v1114_v36, 0  ;;  %v112_v44 = vperm.slane %v1114_v36, 1 }
  0x10   :  { %138 = vmatpush.msra.mxu0 %v117_v22  ;;  %v151_v59 = vadd.s32 16, %v149_v57  ;;  %v159_v60 = vshra.s32 %v149_v57, 4  ;;  %v1126_v61 = vshra.s32 %v158_v58, 3  ;;  %v150_v1 = vadd.s32 8, %v149_v57 }
  0x12   :  { %139 = vmatpush.msra.mxu0 %v116_v23  ;;  %v161_v63 = vshra.s32 %v151_v59, 4  ;;  %vm168_vm8 = vcmp.eq.s32.totalorder %v159_v60, %v1126_v61  ;;  %v155_v23 = vadd.s32 48, %v149_v57 }
  0x13   :  { %v902_v5 = vpop.eup %901 }
  0x14   :  { %v65_v6 = vmul.f32 32.0, %v902_v5  ;;  %vm69_vm1 = vweird.f32 %v902_v5  ;;  %140 = vmatpush.msra.mxu0 %v115_v24  ;;  %vm170_vm9 = vcmp.eq.s32.totalorder %v161_v63, %v1126_v61 }
  0x16   :  { %62 = vadd.xlane.f32.xlu0 %v61_v3  ;;  %v66_v7 = vsub.f32 1.0, %v65_v6  ;;  %v152_v3 = vadd.s32 24, %v149_v57  ;;  %v1134_v6 = vsel %vm170_vm9, 1.0, %v1036_v4 }
  0x18   :  { %v67_v8 = vmul.f32 %v902_v5, %v66_v7 }
  0x1a   :  { %v68_v9 = vadd.f32 %v902_v5, %v67_v8  ;;  %v160_v8 = vshra.s32 %v150_v1, 4 }
  0x1c   :  { %v1092_v10 = vsel %vm69_vm1, %v902_v5, %v68_v9  ;;  %v1132_v5 = vsel %vm168_vm8, 1.0, %v1036_v4  ;;  %v162_v9 = vshra.s32 %v152_v3, 4  ;;  %vm169_vm10 = vcmp.eq.s32.totalorder %v160_v8, %v1126_v61 }
  0x1e   :  { %vm171_vm11 = vcmp.eq.s32.totalorder %v162_v9, %v1126_v61 }
  0x81   :  { %v60_v11 = vpop.xlane.xlu0 %59 }
  0x82   :  { %v71_v12 = vmul.f32 %v1092_v10, %v60_v11 }
  0x84   :  { %v73_v13 = vsub.f32 %v1084_v0, %v71_v12 }
  0x86   :  { %v75_v14 = vmul.f32 %v73_v13, %v73_v13 }
  0x88   :  { %v77_v15 = vsel %vm57_vm0, %v75_v14, 0.0  ;;  %v1146_v14 = vsel %vm169_vm10, 1.0, %v1036_v4 }
  0x89   :  { %78 = vadd.xlane.f32.xlu1 %v77_v15  ;;  %v63_v16 = vpop.xlane.xlu0 %62  ;;  %v1148_v15 = vsel %vm171_vm11, 1.0, %v1036_v4 }
  0x8a   :  { %v72_v17 = vmul.f32 %v1092_v10, %v63_v16 }
  0x8c   :  { %v74_v18 = vsub.f32 %v1088_v2, %v72_v17 }
  0x8e   :  { %v76_v19 = vmul.f32 %v74_v18, %v74_v18 }
  0x90   :  { %v80_v20 = vsel %vm57_vm0, %v76_v19, 0.0  ;;  %v154_v19 = vadd.s32 40, %v149_v57 }
  0x91   :  { %81 = vadd.xlane.f32.xlu1 %v80_v20 }
  0x92   :  { %v164_v21 = vshra.s32 %v154_v19, 4 }
  0x94   :  { %vm173_vm13 = vcmp.eq.s32.totalorder %v164_v21, %v1126_v61 }
  0x95   :  { %v1163_v24 = vsel %vm173_vm13, 1.0, %v1036_v4 }
  0xfc   :  { %v79_v25 = vpop.xlane.xlu1 %78 }
  0xfd   :  { %v83_v26 = vmul.f32 %v79_v25, %v1092_v10  ;;  %v165_v25 = vshra.s32 %v155_v23, 4 }
  0xff   :  { %v85_v27 = vadd.f32 1e-05, %v83_v26  ;;  %vm174_vm14 = vcmp.eq.s32.totalorder %v165_v25, %v1126_v61 }
 0x101   :  { %903 = vrsqrt.f32 %v85_v27  ;;  %vm93_vm3 = vweird.f32 %v85_v27 }
 0x104   :  { %v82_v28 = vpop.xlane.xlu1 %81 }
 0x105   :  { %v84_v29 = vmul.f32 %v82_v28, %v1092_v10  ;;  %v1171_v28 = vsel %vm174_vm14, 1.0, %v1036_v4 }
 0x107   :  { %v904_v30 = vpop.eup %903  ;;  %v86_v31 = vadd.f32 1e-05, %v84_v29 }
 0x108   :  { %v88_v32 = vmul.f32 %v904_v30, %v85_v27  ;;  %vm94_vm2 = vweird.f32 %v904_v30  ;;  %v1169_v27 = vadd.s32 56, %v149_v57 }
 0x109   :  { %905 = vrsqrt.f32 %v86_v31  ;;  %vm95_vm4 = vmor %vm93_vm3, %vm94_vm2  ;;  %vm103_vm6 = vweird.f32 %v86_v31  ;;  %vm307_vm3 = vcmask 130048  }
 0x10a   :  { %v89_v33 = vmul.f32 %v904_v30, %v88_v32  ;;  %v166_v29 = vshra.s32 %v1169_v27, 4 }
 0x10c   :  { %v90_v34 = vmul.f32 0.5, %v89_v33  ;;  %vm175_vm15 = vcmp.eq.s32.totalorder %v166_v29, %v1126_v61  ;;  %v200_v33 = vand.u32 15, %v149_v57 }
 0x10e   :  { %v91_v35 = vsub.f32 1.5, %v90_v34  ;;  %v202_v34 = vand.u32 15, %v151_v59 }
 0x10f   :  { %v906_v37 = vpop.eup %905 }
 0x110   :  { %v92_v38 = vmul.f32 %v904_v30, %v91_v35  ;;  %v98_v39 = vmul.f32 %v906_v37, %v86_v31  ;;  %vm104_vm5 = vweird.f32 %v906_v37  ;;  %v1178_v31 = vsel %vm175_vm15, 1.0, %v1036_v4 }
 0x111   :  { %vm105_vm7 = vmor %vm103_vm6, %vm104_vm5  ;;  %v208_v35 = vshra.s32 %v200_v33, 3 }
 0x112   :  { %v96_v41 = vsel %vm95_vm4, %v904_v30, %v92_v38  ;;  %v99_v42 = vmul.f32 %v906_v37, %v98_v39  ;;  %v201_v38 = vand.u32 15, %v150_v1  ;;  %v203_v39 = vand.u32 15, %v152_v3 }
 0x113   :  { %v107_v43 = vmul.f32 %v96_v41, %v73_v13  ;;  %v153_v13 = vadd.s32 32, %v149_v57  ;;  %vm216_vm1 = vcmp.eq.s32.totalorder %v208_v35, %v1126_v61  ;;  %v205_v1 = vand.u32 15, %v154_v19 }
 0x114   :  { %v100_v45 = vmul.f32 0.5, %v99_v42  ;;  %v207_v19 = vand.u32 15, %v1169_v27 }
 0x115   :  { %v110_v46 = vmul.f32 %v109_v40, %v107_v43  ;;  %v163_v16 = vshra.s32 %v153_v13, 4  ;;  %v209_v43 = vshra.s32 %v201_v38, 3 }
 0x116   :  { %v101_v47 = vsub.f32 1.5, %v100_v45 }
 0x117   :  { %v113_v48 = vadd.f32 %v112_v44, %v110_v46  ;;  %vm172_vm12 = vcmp.eq.s32.totalorder %v163_v16, %v1126_v61  ;;  %vm217_vm4 = vcmp.eq.s32.totalorder %v209_v43, %v1126_v61 }
 0x118   :  { %v102_v49 = vmul.f32 %v906_v37, %v101_v47  ;;  %v1157_v20 = vsel %vm172_vm12, 1.0, %v1036_v4  ;;  %v213_v4 = vshra.s32 %v205_v1, 3 }
 0x119   :  { %848 = vmatmul.msk.f32.vlgmr.msra.gmra.mxu0 %vm57_vm0, %v113_v48 }
 0x11a   :  { %v106_v50 = vsel %vm105_vm7, %v906_v37, %v102_v49  ;;  %v210_v37 = vshra.s32 %v202_v34, 3  ;;  %vm221_vm7 = vcmp.eq.s32.totalorder %v213_v4, %v1126_v61 }
 0x11b   :  { %v108_v51 = vmul.f32 %v106_v50, %v74_v18 }
 0x11c   :  { %vm218_vm2 = vcmp.eq.s32.totalorder %v210_v37, %v1126_v61 }
 0x11d   :  { %v111_v52 = vmul.f32 %v109_v40, %v108_v51  ;;  %v1037_v40 = vmov -1e+30   ;;  %v204_v51 = vand.u32 15, %v153_v13 }
 0x11e   :  { %v224_v41 = vsel %vm216_vm1, 0.0, %v1037_v40  ;;  %v226_v42 = vsel %vm218_vm2, 0.0, %v1037_v40 }
 0x11f   :  { %v114_v53 = vadd.f32 %v112_v44, %v111_v52  ;;  %v211_v44 = vshra.s32 %v203_v39, 3  ;;  %v225_v52 = vsel %vm217_vm4, 0.0, %v1037_v40  ;;  %v212_v56 = vshra.s32 %v204_v51, 3 }
 0x121   :  { %849 = vmatmul.msk.f32.gmra.mxu0 %vm57_vm0, %v114_v53  ;;  %vm219_vm5 = vcmp.eq.s32.totalorder %v211_v44, %v1126_v61  ;;  %vm220_vm6 = vcmp.eq.s32.totalorder %v212_v56, %v1126_v61 }
 0x122   :  { %v227_v53 = vsel %vm219_vm5, 0.0, %v1037_v40  ;;  %v228_v3 = vsel %vm220_vm6, 0.0, %v1037_v40 }
 0x196   :  { %v1120_v54 = vpop.f32.mrf.mxu0 }
 0x197   :  { %v192_v11 = vmul.f32 %v1132_v5, %v1120_v54  ;;  %v194_v12 = vmul.f32 %v1134_v6, %v1120_v54  ;;  %v196_v22 = vmul.f32 %v1157_v20, %v1120_v54  ;;  %v198_v30 = vmul.f32 %v1171_v28, %v1120_v54 }
 0x19e   :  { %v1122_v55 = vpop.f32.mrf.mxu0 }
 0x19f   :  { %236 = vrot.lane.b32.xlu2 %v1122_v55, %s1035_s2  ;;  %v193_v17 = vmul.f32 %v1146_v14, %v1122_v55  ;;  %v195_v18 = vmul.f32 %v1148_v15, %v1122_v55  ;;  %v197_v26 = vmul.f32 %v1163_v24, %v1122_v55  ;;  %v199_v32 = vmul.f32 %v1178_v31, %v1122_v55 }
 0x1a7   :  { %234 = vrot.lane.b32.xlu2 %v1120_v54, %s1035_s2 }
 0x1f9   :  { %v237_v62 = vpop.permute.xlu2 %236 }
 0x1fa   :  { %858 = vmatpush.xpose.msk.msrb.mxu0 %vm57_vm0, %v237_v62  ;;  %882 = vmatpush.xpose.msk.msra.mxu1 %vm57_vm0, %v237_v62 }
 0x201   :  { %v235_v7 = vpop.permute.xlu2 %234 }
 0x202   :  { %859 = vmatpush.xpose.msk.msrb.mxu0 %vm57_vm0, %v235_v7  ;;  %883 = vmatpush.xpose.msk.msra.mxu1 %vm57_vm0, %v235_v7 }
 0x205   :  { %860 = vmatmul.msk.f32.vlgmr.msrb.gmra.mxu0 %vm57_vm0, %v192_v11  ;;  %862 = vmatmul.msk.f32.vlgmr.msra.gmra.mxu1 %vm57_vm0, %v194_v12  ;;  %v206_v11 = vand.u32 15, %v155_v23  ;;  %v229_v12 = vsel %vm221_vm7, 0.0, %v1037_v40 }
 0x207   :  { %v214_v13 = vshra.s32 %v206_v11, 3  ;;  %v896_v11 = vpack.i.bf16 %v1120_v54, %v1122_v55 }
 0x209   :  { %vm222_vm8 = vcmp.eq.s32.totalorder %v214_v13, %v1126_v61 }
 0x20a   :  { %v230_v21 = vsel %vm222_vm8, 0.0, %v1037_v40 }
 0x20d   :  { %861 = vmatmul.msk.f32.gmra.mxu0 %vm57_vm0, %v193_v17  ;;  %863 = vmatmul.msk.f32.gmra.mxu1 %vm57_vm0, %v195_v18 }
 0x215   :  { %864 = vmatmul.msk.f32.gmra.mxu1 %vm57_vm0, %v196_v22  ;;  %v215_v22 = vshra.s32 %v207_v19, 3 }
 0x217   :  { %vm223_vm9 = vcmp.eq.s32.totalorder %v215_v22, %v1126_v61 }
 0x218   :  { %v231_v23 = vsel %vm223_vm9, 0.0, %v1037_v40 }
 0x21d   :  { %865 = vmatmul.msk.f32.gmra.mxu1 %vm57_vm0, %v197_v26 }
 0x225   :  { %866 = vmatmul.msk.f32.gmra.mxu1 %vm57_vm0, %v198_v30 }
 0x22d   :  { %867 = vmatmul.msk.f32.gmra.mxu1 %vm57_vm0, %v199_v32 }
 0x282   :  { %v283_v45 = vpop.f32.mrf.mxu0  ;;  %v289_v46 = vpop.f32.mrf.mxu1 }
 0x283   :  { %v284_v47 = vadd.f32 %v283_v45, %v224_v41  ;;  %v290_v48 = vadd.f32 %v289_v46, %v226_v42 }
 0x285   :  { %v314_v49 = vsel %vm307_vm3, %v290_v48, -inf  ;;  %v308_v50 = vsel %vm307_vm3, %v284_v47, -inf }
 0x286   :  { %315 = vmax.xlane.f32.xlu2 %v314_v49  ;;  %309 = vmax.xlane.f32.xlu0 %v308_v50 }
 0x28a   :  { %v286_v57 = vpop.f32.mrf.mxu0  ;;  %v292_v58 = vpop.f32.mrf.mxu1 }
 0x28b   :  { %v287_v59 = vadd.f32 %v286_v57, %v225_v52  ;;  %v293_v60 = vadd.f32 %v292_v58, %v227_v53 }
 0x28d   :  { %v317_v62 = vsel %vm307_vm3, %v293_v60, -inf  ;;  %v311_v63 = vsel %vm307_vm3, %v287_v59, -inf }
 0x28e   :  { %318 = vmax.xlane.f32.xlu0 %v317_v62  ;;  %312 = vmax.xlane.f32.xlu1 %v311_v63 }
 0x292   :  { %v295_v7 = vpop.f32.mrf.mxu1 }
 0x293   :  { %v296_v8 = vadd.f32 %v295_v7, %v228_v3 }
 0x295   :  { %v320_v9 = vsel %vm307_vm3, %v296_v8, -inf }
 0x296   :  { %321 = vmax.xlane.f32.xlu1 %v320_v9 }
 0x29a   :  { %v298_v16 = vpop.f32.mrf.mxu1 }
 0x29b   :  { %v299_v17 = vadd.f32 %v298_v16, %v229_v12 }
 0x29d   :  { %v323_v18 = vsel %vm307_vm3, %v299_v17, -inf }
 0x29e   :  { %324 = vmax.xlane.f32.xlu0 %v323_v18 }
 0x2a2   :  { %v301_v25 = vpop.f32.mrf.mxu1 }
 0x2a3   :  { %v302_v26 = vadd.f32 %v301_v25, %v230_v21 }
 0x2a5   :  { %v326_v29 = vsel %vm307_vm3, %v302_v26, -inf }
 0x2a6   :  { %327 = vmax.xlane.f32.xlu1 %v326_v29 }
 0x2aa   :  { %v304_v30 = vpop.f32.mrf.mxu1 }
 0x2ab   :  { %v305_v32 = vadd.f32 %v304_v30, %v231_v23 }
 0x2ad   :  { %v329_v33 = vsel %vm307_vm3, %v305_v32, -inf }
 0x2ae   :  { %330 = vmax.xlane.f32.xlu1 %v329_v33 }
 0x2f9   :  { %v316_v34 = vpop.xlane.xlu2 %315  ;;  %v310_v35 = vpop.xlane.xlu0 %309 }
 0x2fa   :  { %v334_v37 = vsub.f32 %v290_v48, %v316_v34  ;;  %v332_v27 = vsub.f32 %v284_v47, %v310_v35 }
 0x2fc   :  { %v344_v38 = vmul.f32 1.442695, %v334_v37  ;;  %v340_v39 = vmul.f32 1.442695, %v332_v27 }
 0x2fe   :  { %907 = vpow2.f32 %v344_v38 }
 0x2ff   :  { %909 = vpow2.f32 %v340_v39 }
 0x301   :  { %v319_v41 = vpop.xlane.xlu0 %318  ;;  %v313_v42 = vpop.xlane.xlu1 %312 }
 0x302   :  { %v335_v43 = vsub.f32 %v293_v60, %v319_v41  ;;  %v333_v44 = vsub.f32 %v287_v59, %v313_v42 }
 0x304   :  { %v1200_v61 = vpop.eup %907  ;;  %v346_v40 = vmul.f32 1.442695, %v335_v43  ;;  %v342_v45 = vmul.f32 1.442695, %v333_v44 }
 0x305   :  { %v1202_v46 = vpop.eup %909  ;;  %v362_v49 = vsel %vm307_vm3, %v1200_v61, 0.0 }
 0x306   :  { %911 = vpow2.f32 %v346_v40  ;;  %v356_v47 = vsel %vm307_vm3, %v1202_v46, 0.0  ;;  %363 = vadd.xlane.f32.xlu1 %v362_v49 }
 0x307   :  { %913 = vpow2.f32 %v342_v45  ;;  %357 = vadd.xlane.f32.xlu0 %v356_v47 }
 0x309   :  { %v322_v48 = vpop.xlane.xlu1 %321 }
 0x30a   :  { %v336_v50 = vsub.f32 %v296_v8, %v322_v48 }
 0x30c   :  { %v1208_v51 = vpop.eup %911  ;;  %v348_v52 = vmul.f32 1.442695, %v336_v50 }
 0x30d   :  { %v1210_v53 = vpop.eup %913  ;;  %v365_v56 = vsel %vm307_vm3, %v1208_v51, 0.0 }
 0x30e   :  { %915 = vpow2.f32 %v348_v52  ;;  %366 = vadd.xlane.f32.xlu1 %v365_v56  ;;  %v359_v57 = vsel %vm307_vm3, %v1210_v53, 0.0 }
 0x30f   :  { %360 = vadd.xlane.f32.xlu0 %v359_v57 }
 0x311   :  { %v325_v58 = vpop.xlane.xlu0 %324 }
 0x312   :  { %v337_v59 = vsub.f32 %v299_v17, %v325_v58 }
 0x314   :  { %v1216_v60 = vpop.eup %915  ;;  %v350_v62 = vmul.f32 1.442695, %v337_v59 }
 0x315   :  { %v368_v63 = vsel %vm307_vm3, %v1216_v60, 0.0 }
 0x316   :  { %917 = vpow2.f32 %v350_v62  ;;  %369 = vadd.xlane.f32.xlu2 %v368_v63 }
 0x319   :  { %v328_v1 = vpop.xlane.xlu1 %327 }
 0x31a   :  { %v338_v3 = vsub.f32 %v302_v26, %v328_v1 }
 0x31c   :  { %v1220_v4 = vpop.eup %917  ;;  %v352_v7 = vmul.f32 1.442695, %v338_v3 }
 0x31d   :  { %v371_v8 = vsel %vm307_vm3, %v1220_v4, 0.0 }
 0x31e   :  { %919 = vpow2.f32 %v352_v7  ;;  %372 = vadd.xlane.f32.xlu1 %v371_v8 }
 0x321   :  { %v331_v9 = vpop.xlane.xlu1 %330 }
 0x322   :  { %v339_v12 = vsub.f32 %v305_v32, %v331_v9 }
 0x323   :  { %897 = vrot.lane.b32.xlu0 %v896_v11, %s1038_s15 }
 0x324   :  { %v1226_v13 = vpop.eup %919  ;;  %v354_v16 = vmul.f32 1.442695, %v339_v12 }
 0x325   :  { %v374_v17 = vsel %vm307_vm3, %v1226_v13, 0.0 }
 0x326   :  { %921 = vpow2.f32 %v354_v16  ;;  %375 = vadd.xlane.f32.xlu2 %v374_v17 }
 0x32c   :  { %v1230_v18 = vpop.eup %921 }
 0x32d   :  { %v377_v19 = vsel %vm307_vm3, %v1230_v18, 0.0 }
 0x32e   :  { %378 = vadd.xlane.f32.xlu1 %v377_v19 }
 0x379   :  { %v1234_v25 = vpop.xlane.xlu1 %363 }
 0x37a   :  { %v358_v21 = vpop.xlane.xlu0 %357  ;;  %v421_v9 = vand.u32 2147483648, %v1234_v25  ;;  %vm415_vm5 = vweird.f32 %v1234_v25  ;;  %v419_v16 = vand.u32 2147483647, %v1234_v25 }
 0x37b   :  { %923 = vrcp.f32 %v358_v21  ;;  %v391_v37 = vand.u32 2147483648, %v358_v21  ;;  %vm385_vm11 = vweird.f32 %v358_v21  ;;  %v389_v27 = vand.u32 2147483647, %v358_v21 }
 0x37c   :  { %vm420_vm7 = vcmp.eq.f32.partialorder %v419_v16, 8.507059e+37 }
 0x37d   :  { %v392_v42 = vor.u32 1.1754944e-38, %v391_v37  ;;  %vm390_vm13 = vcmp.eq.f32.partialorder %v389_v27, 8.507059e+37 }
 0x381   :  { %v924_v54 = vpop.eup %923  ;;  %v1237_v33 = vpop.xlane.xlu1 %366 }
 0x382   :  { %v361_v55 = vpop.xlane.xlu0 %360  ;;  %v381_v22 = vmul.f32 %v924_v54, %v358_v21  ;;  %vm386_vm10 = vweird.f32 %v924_v54  ;;  %vm430_vm9 = vweird.f32 %v1237_v33 }
 0x383   :  { %925 = vrcp.f32 %v361_v55  ;;  %vm387_vm12 = vmor %vm385_vm11, %vm386_vm10  ;;  %v406_v50 = vand.u32 2147483648, %v361_v55  ;;  %vm400_vm15 = vweird.f32 %v361_v55  ;;  %v404_v58 = vand.u32 2147483647, %v361_v55 }
 0x384   :  { %v382_v26 = vsub.f32 1.0, %v381_v22  ;;  %927 = vrcp.f32 %v1234_v25 }
 0x385   :  { %929 = vrcp.f32 %v1237_v33  ;;  %v407_v1 = vor.u32 1.1754944e-38, %v406_v50  ;;  %vm405_vm2 = vcmp.eq.f32.partialorder %v404_v58, 8.507059e+37 }
 0x386   :  { %v383_v23 = vmul.f32 %v924_v54, %v382_v26 }
 0x388   :  { %v384_v34 = vadd.f32 %v924_v54, %v383_v23  ;;  %v436_v23 = vand.u32 2147483648, %v1237_v33 }
 0x389   :  { %v926_v29 = vpop.eup %925  ;;  %v1241_v49 = vpop.xlane.xlu2 %369 }
 0x38a   :  { %v396_v30 = vmul.f32 %v926_v29, %v361_v55  ;;  %v928_v35 = vpop.eup %927  ;;  %v388_v41 = vsel %vm387_vm12, %v924_v54, %v384_v34  ;;  %vm401_vm14 = vweird.f32 %v926_v29  ;;  %931 = vrcp.f32 %v1241_v49 }
 0x38b   :  { %v411_v38 = vmul.f32 %v928_v35, %v1234_v25  ;;  %v393_v40 = vsel %vm390_vm13, %v392_v42, %v388_v41  ;;  %v1243_v48 = vpop.eup %929  ;;  %vm402_vm1 = vmor %vm400_vm15, %vm401_vm14  ;;  %vm416_vm4 = vweird.f32 %v928_v35  ;;  %v422_v54 = vor.u32 1.1754944e-38, %v421_v9 }
 0x38c   :  { %v397_v32 = vsub.f32 1.0, %v396_v30  ;;  %v394_v57 = vmul.f32 %v1202_v46, %v393_v40  ;;  %v426_v62 = vmul.f32 %v1243_v48, %v1237_v33  ;;  %vm417_vm6 = vmor %vm415_vm5, %vm416_vm4  ;;  %vm431_vm8 = vweird.f32 %v1243_v48 }
 0x38d   :  { %v412_v45 = vsub.f32 1.0, %v411_v38  ;;  %v434_v34 = vand.u32 2147483647, %v1237_v33  ;;  %vm432_vm10 = vmor %vm430_vm9, %vm431_vm8  ;;  %vm445_vm15 = vweird.f32 %v1241_v49 }
 0x38e   :  { %v398_v39 = vmul.f32 %v926_v29, %v397_v32  ;;  %v427_v7 = vsub.f32 1.0, %v426_v62 }
 0x38f   :  { %v413_v59 = vmul.f32 %v928_v35, %v412_v45  ;;  %vm435_vm11 = vcmp.eq.f32.partialorder %v434_v34, 8.507059e+37 }
 0x390   :  { %v399_v47 = vadd.f32 %v926_v29, %v398_v39  ;;  %v1252_v46 = vpop.eup %931  ;;  %v428_v17 = vmul.f32 %v1243_v48, %v427_v7  ;;  %v437_v39 = vor.u32 1.1754944e-38, %v436_v23  ;;  %v586_v23 = vld [vmem:[%s1419_s3 + $0x8] sm:$0xff] }
 0x391   :  { %v1245_v56 = vpop.xlane.xlu1 %372  ;;  %v414_v8 = vadd.f32 %v928_v35, %v413_v59  ;;  %v441_v19 = vmul.f32 %v1252_v46, %v1241_v49  ;;  %vm446_vm13 = vweird.f32 %v1252_v46 }
 0x392   :  { %v403_v63 = vsel %vm402_vm1, %v926_v29, %v399_v47  ;;  %933 = vrcp.f32 %v1245_v56  ;;  %v451_v47 = vand.u32 2147483648, %v1241_v49  ;;  %vm447_vm4 = vmor %vm445_vm15, %vm446_vm13 }
 0x393   :  { %v408_v3 = vsel %vm405_vm2, %v407_v1, %v403_v63  ;;  %v418_v21 = vsel %vm417_vm6, %v928_v35, %v414_v8  ;;  %v442_v26 = vsub.f32 1.0, %v441_v19  ;;  %v466_v8 = vand.u32 2147483648, %v1245_v56 }
 0x394   :  { %v409_v12 = vmul.f32 %v1210_v53, %v408_v3  ;;  %v423_v55 = vsel %vm420_vm7, %v422_v54, %v418_v21  ;;  %v429_v53 = vadd.f32 %v1243_v48, %v428_v17  ;;  %v452_v3 = vor.u32 1.1754944e-38, %v451_v47 }
 0x395   :  { %v898_v43 = vpop.permute.xlu0 %897  ;;  %v424_v32 = vmul.f32 %v1200_v61, %v423_v55  ;;  %v443_v35 = vmul.f32 %v1252_v46, %v442_v26  ;;  %vm460_vm7 = vweird.f32 %v1245_v56 }
 0x396   :  { %v899_v44 = vunpack.i.l.bf16 %v898_v43  ;;  %v900_v52 = vunpack.i.h.bf16 %v898_v43  ;;  %v433_v38 = vsel %vm432_vm10, %v1243_v48, %v429_v53 }
 0x397   :  { %v438_v33 = vsel %vm435_vm11, %v437_v39, %v433_v38  ;;  %v444_v40 = vadd.f32 %v1252_v46, %v443_v35 }
 0x398   :  { %544 = vmatpush.msra.mxu2 %v899_v44  ;;  %884 = vmatpush.msra.mxu3 %v899_v44  ;;  %v1263_v22 = vpop.eup %933  ;;  %v439_v50 = vmul.f32 %v1208_v51, %v438_v33 }
 0x399   :  { %v1265_v29 = vpop.xlane.xlu2 %375  ;;  %v456_v37 = vmul.f32 %v1263_v22, %v1245_v56  ;;  %v448_v1 = vsel %vm447_vm4, %v1252_v46, %v444_v40  ;;  %vm461_vm6 = vweird.f32 %v1263_v22 }
 0x39a   :  { %545 = vmatpush.msra.mxu2 %v900_v52  ;;  %885 = vmatpush.msra.mxu3 %v900_v52  ;;  %vm462_vm8 = vmor %vm460_vm7, %vm461_vm6  ;;  %v481_v19 = vand.u32 2147483648, %v1265_v29  ;;  %vm475_vm11 = vweird.f32 %v1265_v29 }
 0x39b   :  { %868 = vmatmul.msk.f32.vlgmr.msra.gmra.mxu2 %vm307_vm3, %v394_v57  ;;  %v457_v43 = vsub.f32 1.0, %v456_v37  ;;  %v449_v57 = vand.u32 2147483647, %v1241_v49 }
 0x39c   :  { %v482_v54 = vor.u32 1.1754944e-38, %v481_v19 }
 0x39d   :  { %v458_v59 = vmul.f32 %v1263_v22, %v457_v43  ;;  %vm450_vm5 = vcmp.eq.f32.partialorder %v449_v57, 8.507059e+37 }
 0x39e   :  { %v453_v51 = vsel %vm450_vm5, %v452_v3, %v448_v1 }
 0x39f   :  { %v459_v7 = vadd.f32 %v1263_v22, %v458_v59  ;;  %v454_v9 = vmul.f32 %v1216_v60, %v453_v51  ;;  %v479_v60 = vand.u32 2147483647, %v1265_v29 }
 0x3a1   :  { %v379_v11 = vpop.xlane.xlu1 %378  ;;  %vm480_vm13 = vcmp.eq.f32.partialorder %v479_v60, 8.507059e+37 }
 0x3a2   :  { %935 = vrcp.f32 %v379_v11  ;;  %v496_v41 = vand.u32 2147483648, %v379_v11  ;;  %v494_v61 = vand.u32 2147483647, %v379_v11  ;;  %vm490_vm14 = vweird.f32 %v379_v11 }
 0x3a3   :  { %869 = vmatmul.msk.f32.gmra.mxu2 %vm307_vm3, %v409_v12  ;;  %937 = vrcp.f32 %v1265_v29  ;;  %v467_v12 = vor.u32 1.1754944e-38, %v466_v8  ;;  %v672_v8 = vld [vmem:[%s1420_s4 + $0x8] sm:$0xff] }
 0x3a4   :  { %v497_v48 = vor.u32 1.1754944e-38, %v496_v41  ;;  %vm495_vm2 = vcmp.eq.f32.partialorder %v494_v61, 8.507059e+37 }
 0x3a8   :  { %v936_v25 = vpop.eup %935 }
 0x3a9   :  { %v486_v30 = vmul.f32 %v936_v25, %v379_v11  ;;  %vm491_vm12 = vweird.f32 %v936_v25  ;;  %v938_v45 = vpop.eup %937  ;;  %v463_v11 = vsel %vm462_vm8, %v1263_v22, %v459_v7  ;;  %v673_v7 = vld [vmem:[%s1420_s4 + $0x10] sm:$0xff] }
 0x3aa   :  { %vm492_vm1 = vmor %vm490_vm14, %vm491_vm12  ;;  %v471_v62 = vmul.f32 %v938_v45, %v1265_v29  ;;  %vm476_vm10 = vweird.f32 %v938_v45  ;;  %v587_v29 = vld [vmem:[%s1419_s3 + $0x10] sm:$0xff] }
 0x3ab   :  { %v487_v27 = vsub.f32 1.0, %v486_v30  ;;  %870 = vmatmul.msk.f32.gmra.mxu2 %vm307_vm3, %v424_v32  ;;  %vm477_vm12 = vmor %vm475_vm11, %vm476_vm10 }
 0x3ac   :  { %v472_v49 = vsub.f32 1.0, %v471_v62 }
 0x3ad   :  { %v488_v42 = vmul.f32 %v936_v25, %v487_v27 }
 0x3ae   :  { %v473_v46 = vmul.f32 %v938_v45, %v472_v49  ;;  %v674_v49 = vld [vmem:[%s1420_s4 + $0x18] sm:$0xff] }
 0x3af   :  { %v489_v44 = vadd.f32 %v936_v25, %v488_v42  ;;  %694 = vmatpush.msra.mxu0 %v674_v49 }
 0x3b0   :  { %v474_v17 = vadd.f32 %v938_v45, %v473_v46 }
 0x3b1   :  { %v493_v52 = vsel %vm492_vm1, %v936_v25, %v489_v44  ;;  %v588_v25 = vld [vmem:[%s1419_s3 + $0x18] sm:$0xff]  ;;  %695 = vmatpush.msra.mxu0 %v673_v7 }
 0x3b2   :  { %v498_v58 = vsel %vm495_vm2, %v497_v48, %v493_v52  ;;  %608 = vmatpush.msrb.mxu3 %v588_v25 }
 0x3b3   :  { %871 = vmatmul.msk.f32.gmra.mxu2 %vm307_vm3, %v439_v50  ;;  %v499_v63 = vmul.f32 %v1230_v18, %v498_v58  ;;  %v464_v18 = vand.u32 2147483647, %v1245_v56  ;;  %v478_v56 = vsel %vm477_vm12, %v938_v45, %v474_v17  ;;  %696 = vmatpush.msra.mxu0 %v672_v8 }
 0x3b4   :  { %v483_v55 = vsel %vm480_vm13, %v482_v54, %v478_v56  ;;  %609 = vmatpush.msrb.mxu3 %v587_v29 }
 0x3b5   :  { %875 = vmatmul.msk.f32.vlgmr.msra.gmra.mxu3 %vm307_vm3, %v499_v63  ;;  %vm465_vm9 = vcmp.eq.f32.partialorder %v464_v18, 8.507059e+37  ;;  %v484_v22 = vmul.f32 %v1226_v13, %v483_v55  ;;  %v585_v13 = vld [vmem:[%s1419_s3] sm:$0xff]  ;;  %s834_s3 = sshll.u32 %s1422_s6, 4  ;;  %s835_s3 = int_to_ptr.hbm [resolvable:$true] %s834_s3 }
 0x3b6   :  { %v468_v16 = vsel %vm465_vm9, %v467_v12, %v463_v11  ;;  %610 = vmatpush.msrb.mxu3 %v586_v23 }
 0x3b7   :  { %v469_v21 = vmul.f32 %v1220_v4, %v468_v16 }
 0x3b8   :  { %611 = vmatpush.msrb.mxu3 %v585_v13 }
 0x3bb   :  { %872 = vmatmul.msk.f32.gmra.mxu2 %vm307_vm3, %v454_v9  ;;  %v671_v9 = vld [vmem:[%s1420_s4] sm:$0xff] }
 0x3bc   :  { %697 = vmatpush.msra.mxu0 %v671_v9 }
 0x3c3   :  { %873 = vmatmul.msk.f32.gmra.mxu2 %vm307_vm3, %v469_v21 }
 0x3cb   :  { %874 = vmatmul.msk.f32.gmra.mxu2 %vm307_vm3, %v484_v22 }
 0x41e   :  { %v547_v26 = vpop.f32.mrf.mxu2 }
 0x41f   :  { %v571_v37 = vmul.f32 %v1132_v5, %v547_v26 }
 0x426   :  { %v550_v53 = vpop.f32.mrf.mxu2 }
 0x427   :  { %v572_v33 = vmul.f32 %v1146_v14, %v550_v53  ;;  %v665_v53 = vperm.slane %v1114_v36, 3 }
 0x42e   :  { %v553_v4 = vpop.f32.mrf.mxu2 }
 0x42f   :  { %v573_v35 = vmul.f32 %v1134_v6, %v553_v4 }
 0x431   :  { %v579_v38 = vadd.f32 %v573_v35, %v571_v37 }
 0x436   :  { %v556_v30 = vpop.f32.mrf.mxu2 }
 0x437   :  { %v574_v41 = vmul.f32 %v1148_v15, %v556_v30  ;;  %v589_v15 = vperm.slane %v1114_v36, 2 }
 0x438   :  { %v568_v6 = vpop.f32.mrf.mxu3 }
 0x439   :  { %v580_v40 = vadd.f32 %v574_v41, %v572_v33  ;;  %v578_v5 = vmul.f32 %v1178_v31, %v568_v6 }
 0x43e   :  { %v559_v32 = vpop.f32.mrf.mxu2 }
 0x43f   :  { %v575_v27 = vmul.f32 %v1157_v20, %v559_v32 }
 0x441   :  { %v581_v42 = vadd.f32 %v579_v38, %v575_v27 }
 0x446   :  { %v562_v34 = vpop.f32.mrf.mxu2 }
 0x447   :  { %v576_v43 = vmul.f32 %v1163_v24, %v562_v34 }
 0x449   :  { %v582_v45 = vadd.f32 %v580_v40, %v576_v43 }
 0x44b   :  { %v584_v20 = vadd.f32 %v582_v45, %v578_v5  ;;  %v792_v45 = vld [vmem:[%s1421_s5 + $0x38] sm:$0xff]  ;;  %v791_v5 = vld [vmem:[%s1421_s5 + $0x30] sm:$0xff] }
 0x44c   :  { %809 = vmatpush.msra.mxu3 %v792_v45 }
 0x44e   :  { %v565_v39 = vpop.f32.mrf.mxu2  ;;  %810 = vmatpush.msra.mxu3 %v791_v5 }
 0x44f   :  { %v577_v61 = vmul.f32 %v1171_v28, %v565_v39  ;;  %v675_v39 = vperm.slane %v1114_v36, 5 }
 0x451   :  { %v583_v44 = vadd.f32 %v581_v42, %v577_v61 }
 0x453   :  { %876 = vmatmul.msk.f32.vlgmr.msrb.gmra.mxu3 %vm57_vm0, %v583_v44 }
 0x45b   :  { %877 = vmatmul.msk.f32.gmra.mxu3 %vm57_vm0, %v584_v20 }
 0x4d6   :  { %v613_v47 = vpop.f32.mrf.mxu3 }
 0x4d7   :  { %v614_v48 = vadd.f32 %v613_v47, %v589_v15 }
 0x4d9   :  { %v1332_v28 = vadd.f32 %v614_v48, %v1084_v0 }
 0x4db   :  { %v621_v14 = vsel %vm57_vm0, %v1332_v28, 0.0 }
 0x4dc   :  { %622 = vadd.xlane.f32.xlu2 %v621_v14  ;;  %v789_v14 = vld [vmem:[%s1421_s5 + $0x20] sm:$0xff] }
 0x4de   :  { %v616_v24 = vpop.f32.mrf.mxu3 }
 0x4df   :  { %v617_v50 = vadd.f32 %v616_v24, %v589_v15  ;;  %v790_v15 = vld [vmem:[%s1421_s5 + $0x28] sm:$0xff] }
 0x4e0   :  { %811 = vmatpush.msra.mxu3 %v790_v15 }
 0x4e1   :  { %v1337_v52 = vadd.f32 %v617_v50, %v1088_v2 }
 0x4e2   :  { %812 = vmatpush.msra.mxu3 %v789_v14 }
 0x4e3   :  { %v624_v31 = vsel %vm57_vm0, %v1337_v52, 0.0 }
 0x4e4   :  { %625 = vadd.xlane.f32.xlu0 %v624_v31  ;;  %v788_v31 = vld [vmem:[%s1421_s5 + $0x18] sm:$0xff] }
 0x4e5   :  { %813 = vmatpush.msra.mxu3 %v788_v31 }
 0x54f   :  { %v623_v57 = vpop.xlane.xlu2 %622 }
 0x550   :  { %v627_v58 = vmul.f32 %v623_v57, %v1092_v10 }
 0x552   :  { %v629_v59 = vsub.f32 %v1332_v28, %v627_v58 }
 0x554   :  { %v631_v0 = vmul.f32 %v629_v59, %v629_v59 }
 0x556   :  { %v633_v62 = vsel %vm57_vm0, %v631_v0, 0.0 }
 0x557   :  { %634 = vadd.xlane.f32.xlu1 %v633_v62  ;;  %v626_v63 = vpop.xlane.xlu0 %625 }
 0x558   :  { %v628_v1 = vmul.f32 %v626_v63, %v1092_v10  ;;  %v786_v63 = vld [vmem:[%s1421_s5 + $0x8] sm:$0xff] }
 0x55a   :  { %v630_v3 = vsub.f32 %v1337_v52, %v628_v1  ;;  %v785_v1 = vld [vmem:[%s1421_s5] sm:$0xff] }
 0x55c   :  { %v632_v2 = vmul.f32 %v630_v3, %v630_v3 }
 0x55e   :  { %v636_v51 = vsel %vm57_vm0, %v632_v2, 0.0 }
 0x55f   :  { %637 = vadd.xlane.f32.xlu2 %v636_v51 }
 0x5ca   :  { %v635_v18 = vpop.xlane.xlu1 %634 }
 0x5cb   :  { %v639_v46 = vmul.f32 %v635_v18, %v1092_v10 }
 0x5cd   :  { %v641_v11 = vadd.f32 1e-05, %v639_v46 }
 0x5cf   :  { %939 = vrsqrt.f32 %v641_v11  ;;  %vm649_vm14 = vweird.f32 %v641_v11 }
 0x5d2   :  { %v638_v12 = vpop.xlane.xlu2 %637 }
 0x5d3   :  { %v640_v16 = vmul.f32 %v638_v12, %v1092_v10  ;;  %v668_v10 = vperm.slane %v1114_v36, 4 }
 0x5d5   :  { %v940_v17 = vpop.eup %939  ;;  %v642_v19 = vadd.f32 1e-05, %v640_v16 }
 0x5d6   :  { %v644_v21 = vmul.f32 %v940_v17, %v641_v11  ;;  %vm650_vm3 = vweird.f32 %v940_v17 }
 0x5d7   :  { %941 = vrsqrt.f32 %v642_v19  ;;  %vm651_vm15 = vmor %vm649_vm14, %vm650_vm3  ;;  %vm659_vm2 = vweird.f32 %v642_v19  ;;  %vm794_vm3 = vcmask 523264  }
 0x5d8   :  { %v645_v60 = vmul.f32 %v940_v17, %v644_v21 }
 0x5da   :  { %v646_v56 = vmul.f32 0.5, %v645_v60 }
 0x5dc   :  { %v647_v54 = vsub.f32 1.5, %v646_v56 }
 0x5dd   :  { %v942_v55 = vpop.eup %941 }
 0x5de   :  { %v648_v22 = vmul.f32 %v940_v17, %v647_v54  ;;  %v654_v26 = vmul.f32 %v942_v55, %v642_v19  ;;  %vm660_vm1 = vweird.f32 %v942_v55 }
 0x5df   :  { %vm661_vm4 = vmor %vm659_vm2, %vm660_vm1 }
 0x5e0   :  { %v652_v25 = vsel %vm651_vm15, %v940_v17, %v648_v22  ;;  %v655_v4 = vmul.f32 %v942_v55, %v654_v26 }
 0x5e1   :  { %v663_v29 = vmul.f32 %v652_v25, %v629_v59  ;;  %v787_v59 = vld [vmem:[%s1421_s5 + $0x10] sm:$0xff]  ;;  %s1039_s5 = smov [#allocation7]  }
 0x5e2   :  { %v656_v23 = vmul.f32 0.5, %v655_v4  ;;  %814 = vmatpush.msra.mxu3 %v787_v59  ;;  %v951_v59 = vld [vmem:[#allocation5] sm:$0xff]  ;;  %s832_s21 = sshll.u32 %s1039_s5, 4  ;;  %s833_s21 = int_to_ptr.vmem [resolvable:$true] %s832_s21 }
 0x5e3   :  { %v666_v13 = vmul.f32 %v665_v53, %v663_v29 }
 0x5e4   :  { %v657_v30 = vsub.f32 1.5, %v656_v23  ;;  %815 = vmatpush.msra.mxu3 %v786_v63 }
 0x5e5   :  { %v669_v32 = vadd.f32 %v668_v10, %v666_v13 }
 0x5e6   :  { %v658_v34 = vmul.f32 %v942_v55, %v657_v30  ;;  %816 = vmatpush.msra.mxu3 %v785_v1 }
 0x5e7   :  { %878 = vmatmul.msk.f32.vlgmr.msra.gmra.mxu0 %vm57_vm0, %v669_v32 }
 0x5e8   :  { %v662_v35 = vsel %vm661_vm4, %v942_v55, %v658_v34 }
 0x5e9   :  { %v664_v37 = vmul.f32 %v662_v35, %v630_v3 }
 0x5eb   :  { %v667_v27 = vmul.f32 %v665_v53, %v664_v37 }
 0x5ed   :  { %v670_v38 = vadd.f32 %v668_v10, %v667_v27 }
 0x5ef   :  { %879 = vmatmul.msk.f32.gmra.mxu0 %vm57_vm0, %v670_v38 }
 0x664   :  { %v699_v41 = vpop.f32.mrf.mxu0 }
 0x665   :  { %v1366_v42 = vadd.f32 %v699_v41, %v675_v39 }
 0x667   :  { %v1369_v61 = vmul.f32 0.70710677, %v1366_v42  ;;  %v705_v5 = vmul.f32 0.5, %v1366_v42 }
 0x669   :  { %v709_v33 = vand.u32 2147483647, %v1369_v61  ;;  %vm775_vm13 = vcmp.ge.f32.partialorder %v1369_v61, 0.0 }
 0x66b   :  { %v711_v43 = vmul.f32 0.3275911, %v709_v33  ;;  %v763_v8 = vsub.f32 0.0, %v709_v33 }
 0x66c   :  { %v702_v44 = vpop.f32.mrf.mxu0 }
 0x66d   :  { %v713_v40 = vadd.f32 1.0, %v711_v43  ;;  %v1372_v6 = vadd.f32 %v702_v44, %v675_v39  ;;  %v765_v16 = vmul.f32 %v763_v8, %v709_v33 }
 0x66f   :  { %943 = vrcp.f32 %v713_v40  ;;  %v1378_v36 = vmul.f32 0.70710677, %v1372_v6  ;;  %v726_v58 = vand.u32 2147483648, %v713_v40  ;;  %v724_v62 = vand.u32 2147483647, %v713_v40 }
 0x670   :  { %vm720_vm6 = vweird.f32 %v713_v40  ;;  %v767_v55 = vmul.f32 1.442695, %v765_v16 }
 0x671   :  { %v710_v20 = vand.u32 2147483647, %v1378_v36  ;;  %v727_v2 = vor.u32 1.1754944e-38, %v726_v58  ;;  %vm725_vm8 = vcmp.eq.f32.partialorder %v724_v62, 8.507059e+37  ;;  %vm776_vm14 = vcmp.ge.f32.partialorder %v1378_v36, 0.0 }
 0x673   :  { %v712_v47 = vmul.f32 0.3275911, %v710_v20  ;;  %v764_v53 = vsub.f32 0.0, %v710_v20 }
 0x675   :  { %v944_v48 = vpop.eup %943  ;;  %v714_v50 = vadd.f32 1.0, %v712_v47  ;;  %v766_v13 = vmul.f32 %v764_v53, %v710_v20 }
 0x676   :  { %v716_v24 = vmul.f32 %v944_v48, %v713_v40  ;;  %vm721_vm5 = vweird.f32 %v944_v48 }
 0x677   :  { %945 = vrcp.f32 %v714_v50  ;;  %vm722_vm7 = vmor %vm720_vm6, %vm721_vm5  ;;  %v741_v12 = vand.u32 2147483648, %v714_v50  ;;  %v739_v19 = vand.u32 2147483647, %v714_v50  ;;  %vm735_vm10 = vweird.f32 %v714_v50 }
 0x678   :  { %v717_v57 = vsub.f32 1.0, %v716_v24  ;;  %947 = vpow2.f32 %v767_v55  ;;  %v769_v37 = vmul.f32 1.442695, %v766_v13 }
 0x679   :  { %v742_v54 = vor.u32 1.1754944e-38, %v741_v12  ;;  %vm740_vm12 = vcmp.eq.f32.partialorder %v739_v19, 8.507059e+37 }
 0x67a   :  { %v718_v0 = vmul.f32 %v944_v48, %v717_v57  ;;  %949 = vpow2.f32 %v769_v37  ;;  %v706_v57 = vmul.f32 0.5, %v1372_v6 }
 0x67c   :  { %v719_v3 = vadd.f32 %v944_v48, %v718_v0  ;;  %v793_v0 = vperm.slane %v951_v59, 6 }
 0x67d   :  { %v946_v51 = vpop.eup %945 }
 0x67e   :  { %v723_v49 = vsel %vm722_vm7, %v944_v48, %v719_v3  ;;  %v731_v9 = vmul.f32 %v946_v51, %v714_v50  ;;  %vm736_vm9 = vweird.f32 %v946_v51  ;;  %v948_v27 = vpop.eup %947 }
 0x67f   :  { %v728_v7 = vsel %vm725_vm8, %v727_v2, %v723_v49  ;;  %vm737_vm11 = vmor %vm735_vm10, %vm736_vm9 }
 0x680   :  { %v745_v18 = vmul.f32 1.0614054, %v728_v7  ;;  %v732_v46 = vsub.f32 1.0, %v731_v9  ;;  %v950_v47 = vpop.eup %949 }
 0x682   :  { %v747_v11 = vadd.f32 -1.4531521, %v745_v18  ;;  %v733_v17 = vmul.f32 %v946_v51, %v732_v46 }
 0x684   :  { %v749_v21 = vmul.f32 %v747_v11, %v728_v7  ;;  %v734_v60 = vadd.f32 %v946_v51, %v733_v17 }
 0x686   :  { %v751_v56 = vadd.f32 1.4214138, %v749_v21  ;;  %v738_v22 = vsel %vm737_vm11, %v946_v51, %v734_v60 }
 0x687   :  { %v743_v25 = vsel %vm740_vm12, %v742_v54, %v738_v22 }
 0x688   :  { %v753_v26 = vmul.f32 %v751_v56, %v728_v7  ;;  %v746_v4 = vmul.f32 1.0614054, %v743_v25 }
 0x68a   :  { %v755_v29 = vadd.f32 -0.28449672, %v753_v26  ;;  %v748_v10 = vadd.f32 -1.4531521, %v746_v4 }
 0x68c   :  { %v757_v23 = vmul.f32 %v755_v29, %v728_v7  ;;  %v750_v30 = vmul.f32 %v748_v10, %v743_v25 }
 0x68e   :  { %v759_v32 = vadd.f32 0.2548296, %v757_v23  ;;  %v752_v34 = vadd.f32 1.4214138, %v750_v30 }
 0x690   :  { %v761_v35 = vmul.f32 %v759_v32, %v728_v7  ;;  %v754_v38 = vmul.f32 %v752_v34, %v743_v25 }
 0x692   :  { %v771_v39 = vmul.f32 %v948_v27, %v761_v35  ;;  %v756_v41 = vadd.f32 -0.28449672, %v754_v38 }
 0x694   :  { %v773_v33 = vsub.f32 1.0, %v771_v39  ;;  %v758_v43 = vmul.f32 %v756_v41, %v743_v25 }
 0x696   :  { %v777_v44 = vsub.f32 0.0, %v773_v33  ;;  %v760_v40 = vadd.f32 0.2548296, %v758_v43 }
 0x698   :  { %v779_v45 = vsel %vm775_vm13, %v773_v33, %v777_v44  ;;  %v762_v15 = vmul.f32 %v760_v40, %v743_v25 }
 0x699   :  { %v781_v20 = vadd.f32 1.0, %v779_v45 }
 0x69a   :  { %v772_v14 = vmul.f32 %v950_v47, %v762_v15 }
 0x69b   :  { %v783_v48 = vmul.f32 %v781_v20, %v705_v5 }
 0x69c   :  { %v774_v24 = vsub.f32 1.0, %v772_v14 }
 0x69d   :  { %880 = vmatmul.msk.f32.vlgmr.msra.gmra.mxu3 %vm794_vm3, %v783_v48 }
 0x69e   :  { %v778_v50 = vsub.f32 0.0, %v774_v24 }
 0x6a0   :  { %v780_v31 = vsel %vm776_vm14, %v774_v24, %v778_v50 }
 0x6a1   :  { %v782_v58 = vadd.f32 1.0, %v780_v31 }
 0x6a3   :  { %v784_v61 = vmul.f32 %v782_v58, %v706_v57 }
 0x6a5   :  { %881 = vmatmul.msk.f32.gmra.mxu3 %vm794_vm3, %v784_v61 }
 0x720   :  { %v818_v42 = vpop.f32.mrf.mxu3 }
 0x721   :  { %v819_v62 = vadd.f32 %v818_v42, %v793_v0 }
 0x723   :  { %v824_v63 = vadd.f32 %v819_v62, %v1332_v28 }
 0x725   :  { %826 = vst.msk [vmem:[#allocation7] sm:$0xff] %vm57_vm0, %v824_v63 }
 0x728   :  { %v821_v1 = vpop.f32.mrf.mxu3 }
 0x729   :  { %v822_v36 = vadd.f32 %v821_v1, %v793_v0 }
 0x72b   :  { %v825_v6 = vadd.f32 %v822_v36, %v1337_v52 }
 0x72d   :  { %827 = vst.msk [vmem:[#allocation7 + $0x8] sm:$0xff] %vm57_vm0, %v825_v6 }
 0x72e   :  { %840 = dma.vmem_to_hbm [thread:$0]  %s833_s21, 256, %s835_s3, [#allocation4], %s1031_s29, %s1031_s29, %s1032_s30  }
 0x72f   :  { %1028 = dma.done.wait [#allocation4], 256  }
 0x730   :  { %1029 = vsyncadd [#allocation4], 4294967040 }
 0x731   :  { %845 = vsyncpa [#allocation3], 1 }
 0x732   :  { %846 = vsyncpa [#allocation6], 1 }
 0x733   :  { %847 = vsyncpa [#allocation4], 1 }

</bundles_post_ra>
